<compile_context>
chip_gen: v7x
topology: tpu7x:2x2x1
jax: 0.10.0
libtpu: 0.0.40
codegen_flags: <defaults>
</compile_context>

<pallas_src>
import math
from functools import partial

import jax
import jax.numpy as jnp
from jax import lax
from jax.experimental import pallas as pl
from jax.experimental.pallas import tpu as pltpu

EPS = 1e-6


def _vmem_limit_bytes():
    """Scoped-VMEM budget: ~3/4 of physical VMEM, capped at 100 MiB (48 MiB on v7x)."""
    try:
        cap = pltpu.get_tpu_info().vmem_capacity_bytes
    except Exception:
        cap = 64 * 1024 * 1024          # conservative fallback (v7x-sized)
    return int(min(0.75 * cap, 100 * 1024 * 1024))


VMEM_LIMIT = _vmem_limit_bytes()
_BIG_VMEM = VMEM_LIMIT >= 64 * 1024 * 1024   # 128 MiB parts (v5e / v6e)
TM = 512 if _BIG_VMEM else 256
TN = 512 if _BIG_VMEM else 256
TK = 1024 if _BIG_VMEM else 512


def _tile(dim, target):
    """Largest tile <= target that divides dim (halving), else the full dim (toy shapes)."""
    t = target
    while t >= 128 and dim % t:
        t //= 2
    if dim >= t and dim % t == 0:
        return t
    return dim


def _layernorm(x, a, b):
    """Annotated-Transformer LayerNorm: unbiased std, division by (std + eps)."""
    d = x.shape[-1]
    mean = jnp.mean(x, axis=-1, keepdims=True)
    xc = x - mean
    var = jnp.sum(xc * xc, axis=-1, keepdims=True) / (d - 1)
    return a * xc / (jnp.sqrt(var) + EPS) + b


# ------------------------------ kernel bodies ------------------------------ #

def _ln_matmul_kernel(x_ref, a_ref, b_ref, w_ref, bias_ref, o_ref, xn_ref):
    """o = LN(x) @ w + bias.  LN computed once per m-tile (n axis is 'arbitrary')."""
    @pl.when(pl.program_id(1) == 0)
    def _():
        xn_ref[...] = _layernorm(x_ref[...], a_ref[...], b_ref[...]).astype(xn_ref.dtype)

    y = jnp.dot(xn_ref[...], w_ref[...], preferred_element_type=jnp.float32) + bias_ref[...]
    o_ref[...] = y.astype(o_ref.dtype)


def _matmul_kernel(x_ref, w_ref, bias_ref, o_ref, acc_ref, *, cdt):
    """o = x @ w + bias; K-tiled with an f32 accumulator scratch."""
    @pl.when(pl.program_id(2) == 0)
    def _():
        acc_ref[...] = jnp.zeros_like(acc_ref)

    acc_ref[...] += jnp.dot(x_ref[...].astype(cdt), w_ref[...],
                            preferred_element_type=jnp.float32)

    @pl.when(pl.program_id(2) == pl.num_programs(2) - 1)
    def _():
        o_ref[...] = (acc_ref[...] + bias_ref[...]).astype(o_ref.dtype)


def _ffn_kernel(x_ref, a_ref, b_ref, w1_ref, b1_ref, w2_ref, b2_ref, o_ref,
                xn_ref, acc_ref):
    """o = x + (relu(LN(x) @ w1 + b1) @ w2 + b2); d_ff tiled; hidden stays in VMEM."""
    k = pl.program_id(1)

    @pl.when(k == 0)
    def _():
        xn_ref[...] = _layernorm(x_ref[...], a_ref[...], b_ref[...]).astype(xn_ref.dtype)
        acc_ref[...] = jnp.zeros_like(acc_ref)

    h = jnp.dot(xn_ref[...], w1_ref[...], preferred_element_type=jnp.float32)
    h = jnp.maximum(h + b1_ref[...], 0.0)
    acc_ref[...] += jnp.dot(h.astype(w2_ref.dtype), w2_ref[...],
                            preferred_element_type=jnp.float32)

    @pl.when(k == pl.num_programs(1) - 1)
    def _():
        o_ref[...] = acc_ref[...] + b2_ref[...] + x_ref[...]


def _mha_proj_kernel(*refs, H, dk, scale, causal, cdt, approx):
    """Fused MHA + output projection + bias + residual for one batch element.

    Self-attn (causal=True): packed qkv [Sq, 3D], causal mask generated in-kernel.
    Cross-attn: q [Sq, D], packed kv [Sk, 2D], key-padding mask [1, Sk].
    Heads are merged by accumulating per-head (p @ v) @ Wo[h*dk:(h+1)*dk, :] in f32,
    so no concatenate / transpose and a single lane-dense [Sq, D] f32 store.
    """
    D = H * dk
    if causal:
        qkv_ref, wo_ref, bo_ref, res_ref, o_ref = refs
        t = qkv_ref[0]
        q_all, k_all, v_all = t[:, :D], t[:, D:2 * D], t[:, 2 * D:]
        Sq = q_all.shape[0]
        Sk = Sq
        row = lax.broadcasted_iota(jnp.int32, (Sq, Sk), 0)
        col = lax.broadcasted_iota(jnp.int32, (Sq, Sk), 1)
        keep = row >= col                                   # causal mask, no HBM traffic
    else:
        q_ref, kv_ref, mask_ref, wo_ref, bo_ref, res_ref, o_ref = refs
        q_all = q_ref[0]
        t = kv_ref[0]
        k_all, v_all = t[:, :D], t[:, D:]
        Sq = q_all.shape[0]
        keep = mask_ref[0] != 0.0                           # [1, Sk] key-padding mask

    acc = jnp.zeros((Sq, D), jnp.float32)
    for h in range(H):                                      # static unroll over heads
        qh = (q_all[:, h * dk:(h + 1) * dk] * scale).astype(cdt)   # fold 1/sqrt(dk) into q
        kh = k_all[:, h * dk:(h + 1) * dk].astype(cdt)
        vh = v_all[:, h * dk:(h + 1) * dk].astype(cdt)
        # q @ k^T without materializing k.T (contract the dk axes directly)
        s = lax.dot_general(qh, kh, (((1,), (1,)), ((), ())),
                            preferred_element_type=jnp.float32)     # [Sq, Sk]
        s = jnp.where(keep, s, -1e9)                        # masked_fill(mask == 0, -1e9)
        m = jnp.max(s, axis=-1, keepdims=True)
        p = jnp.exp(s - m)
        l = jnp.sum(p, axis=-1, keepdims=True)
        oh = jnp.dot(p.astype(cdt), vh, preferred_element_type=jnp.float32)   # [Sq, dk]
        oh = oh * pl.reciprocal(l, approx=approx)           # normalize after p@v
        # fused output projection: accumulate this head's contribution to o @ Wo
        acc = acc + jnp.dot(oh.astype(cdt), wo_ref[h * dk:(h + 1) * dk, :],
                            preferred_element_type=jnp.float32)               # [Sq, D]
    o_ref[0] = acc + bo_ref[...] + res_ref[0]               # + bias + residual (f32)


# -------------------------------- wrappers --------------------------------- #

def ln_matmul(x2d, a, b, w, bias, compute_dtype, tm=None, tn=None):
    M, D = x2d.shape
    N = w.shape[1]
    tm, tn = _tile(M, tm or TM), _tile(N, tn or TN)
    return pl.pallas_call(
        _ln_matmul_kernel,
        out_shape=jax.ShapeDtypeStruct((M, N), compute_dtype),
        grid=(M // tm, N // tn),
        in_specs=[pl.BlockSpec((tm, D), lambda m, n: (m, 0)),
                  pl.BlockSpec((1, D), lambda m, n: (0, 0)),
                  pl.BlockSpec((1, D), lambda m, n: (0, 0)),
                  pl.BlockSpec((D, tn), lambda m, n: (0, n)),
                  pl.BlockSpec((1, tn), lambda m, n: (0, n))],
        out_specs=pl.BlockSpec((tm, tn), lambda m, n: (m, n)),
        scratch_shapes=[pltpu.VMEM((tm, D), compute_dtype)],
        compiler_params=pltpu.CompilerParams(
            dimension_semantics=("parallel", "arbitrary"),
            vmem_limit_bytes=VMEM_LIMIT),
    )(x2d, a.reshape(1, D), b.reshape(1, D), w, bias.reshape(1, N))


def matmul(x2d, w, bias, compute_dtype, tm=None, tn=None, tk=None):
    M, K = x2d.shape
    N = w.shape[1]
    tm, tn, tk = _tile(M, tm or TM), _tile(N, tn or TN), _tile(K, tk or TK)
    return pl.pallas_call(
        partial(_matmul_kernel, cdt=compute_dtype),
        out_shape=jax.ShapeDtypeStruct((M, N), compute_dtype),
        grid=(M // tm, N // tn, K // tk),
        in_specs=[pl.BlockSpec((tm, tk), lambda m, n, k: (m, k)),
                  pl.BlockSpec((tk, tn), lambda m, n, k: (k, n)),
                  pl.BlockSpec((1, tn), lambda m, n, k: (0, n))],
        out_specs=pl.BlockSpec((tm, tn), lambda m, n, k: (m, n)),
        scratch_shapes=[pltpu.VMEM((tm, tn), jnp.float32)],
        compiler_params=pltpu.CompilerParams(
            dimension_semantics=("parallel", "parallel", "arbitrary"),
            vmem_limit_bytes=VMEM_LIMIT),
    )(x2d, w, bias.reshape(1, N))


def ffn(x2d, a, b, w1, b1, w2, b2, compute_dtype, tm=None, tk=None):
    M, D = x2d.shape
    dff = w1.shape[1]
    tm, tk = _tile(M, tm or TM), _tile(dff, tk or TK)
    return pl.pallas_call(
        _ffn_kernel,
        out_shape=jax.ShapeDtypeStruct((M, D), jnp.float32),
        grid=(M // tm, dff // tk),
        in_specs=[pl.BlockSpec((tm, D), lambda m, k: (m, 0)),
                  pl.BlockSpec((1, D), lambda m, k: (0, 0)),
                  pl.BlockSpec((1, D), lambda m, k: (0, 0)),
                  pl.BlockSpec((D, tk), lambda m, k: (0, k)),
                  pl.BlockSpec((1, tk), lambda m, k: (0, k)),
                  pl.BlockSpec((tk, D), lambda m, k: (k, 0)),
                  pl.BlockSpec((1, D), lambda m, k: (0, 0))],
        out_specs=pl.BlockSpec((tm, D), lambda m, k: (m, 0)),
        scratch_shapes=[pltpu.VMEM((tm, D), compute_dtype),
                        pltpu.VMEM((tm, D), jnp.float32)],
        compiler_params=pltpu.CompilerParams(
            dimension_semantics=("parallel", "arbitrary"),
            vmem_limit_bytes=VMEM_LIMIT),
    )(x2d, a.reshape(1, D), b.reshape(1, D), w1, b1.reshape(1, dff),
      w2, b2.reshape(1, D))


def mha_proj(q_arr, kv_arr, pad_mask, wo, bo, residual, H, dk, scale,
             compute_dtype, approx):
    """Fused attention + Wo + bo + residual.  q_arr: [B,Sq,3D] (self, causal) or [B,Sq,D]."""
    B, Sq = q_arr.shape[0], q_arr.shape[1]
    D = H * dk
    causal = kv_arr is None
    if causal:
        inputs = (q_arr, wo, bo.reshape(1, D), residual)
        in_specs = [pl.BlockSpec((1, Sq, 3 * D), lambda bi: (bi, 0, 0)),
                    pl.BlockSpec((D, D), lambda bi: (0, 0)),
                    pl.BlockSpec((1, D), lambda bi: (0, 0)),
                    pl.BlockSpec((1, Sq, D), lambda bi: (bi, 0, 0))]
    else:
        Sk = kv_arr.shape[1]
        inputs = (q_arr, kv_arr, pad_mask.reshape(B, 1, Sk), wo,
                  bo.reshape(1, D), residual)
        in_specs = [pl.BlockSpec((1, Sq, D), lambda bi: (bi, 0, 0)),
                    pl.BlockSpec((1, Sk, 2 * D), lambda bi: (bi, 0, 0)),
                    pl.BlockSpec((1, 1, Sk), lambda bi: (bi, 0, 0)),
                    pl.BlockSpec((D, D), lambda bi: (0, 0)),
                    pl.BlockSpec((1, D), lambda bi: (0, 0)),
                    pl.BlockSpec((1, Sq, D), lambda bi: (bi, 0, 0))]
    return pl.pallas_call(
        partial(_mha_proj_kernel, H=H, dk=dk, scale=scale, causal=causal,
                cdt=compute_dtype, approx=approx),
        out_shape=jax.ShapeDtypeStruct((B, Sq, D), jnp.float32),
        grid=(B,),
        in_specs=in_specs,
        out_specs=pl.BlockSpec((1, Sq, D), lambda bi: (bi, 0, 0)),
        compiler_params=pltpu.CompilerParams(
            dimension_semantics=("parallel",),
            vmem_limit_bytes=VMEM_LIMIT),
    )(*inputs)


def prepare_params(p, compute_dtype):
    """One-time param prep: fuse QKV / KV weights, cast matmul weights to compute dtype."""
    cdt = compute_dtype
    sa, ca = p["self_attn"], p["src_attn"]
    return {
        "self_attn": {
            "wqkv": jnp.concatenate([sa["wq"], sa["wk"], sa["wv"]], axis=1).astype(cdt),
            "bqkv": jnp.concatenate([sa["bq"], sa["bk"], sa["bv"]]),
            "wo": sa["wo"].astype(cdt), "bo": sa["bo"],
        },
        "src_attn": {
            "wq": ca["wq"].astype(cdt), "bq": ca["bq"],
            "wkv": jnp.concatenate([ca["wk"], ca["wv"]], axis=1).astype(cdt),
            "bkv": jnp.concatenate([ca["bk"], ca["bv"]]),
            "wo": ca["wo"].astype(cdt), "bo": ca["bo"],
        },
        "w1": p["w1"].astype(cdt), "b1": p["b1"],
        "w2": p["w2"].astype(cdt), "b2": p["b2"],
        "ln0_a": p["ln0_a"], "ln0_b": p["ln0_b"],
        "ln1_a": p["ln1_a"], "ln1_b": p["ln1_b"],
        "ln2_a": p["ln2_a"], "ln2_b": p["ln2_b"],
    }


def decoder_layer(x, memory, src_pad_mask, params, num_heads,
                  compute_dtype=jnp.bfloat16):
    """DecoderLayer.forward (dropout is identity in eval mode).

    src_pad_mask: [B, Sm] key-padding mask (1 keep, 0 masked).  The causal target
    mask is generated inside the self-attention kernel.
    """
    B, S, D = x.shape
    Sm = memory.shape[1]
    H = num_heads
    dk = D // H
    scale = 1.0 / math.sqrt(dk)
    cdt = compute_dtype
    approx = jnp.dtype(cdt) != jnp.dtype(jnp.float32)   # EUP reciprocal on bf16 path only

    sa, ca = params["self_attn"], params["src_attn"]

    # sublayer[0]: x + Wo @ self_attn(LN0(x)), causal
    qkv = ln_matmul(x.reshape(B * S, D), params["ln0_a"], params["ln0_b"],
                    sa["wqkv"], sa["bqkv"], cdt)                      # [B*S, 3D] cdt
    x = mha_proj(qkv.reshape(B, S, 3 * D), None, None, sa["wo"], sa["bo"],
                 x, H, dk, scale, cdt, approx)                        # [B, S, D] f32

    # sublayer[1]: x + Wo @ src_attn(LN1(x), memory), key padding mask
    q = ln_matmul(x.reshape(B * S, D), params["ln1_a"], params["ln1_b"],
                  ca["wq"], ca["bq"], cdt)                            # [B*S, D] cdt
    kv = matmul(memory.reshape(B * Sm, D), ca["wkv"], ca["bkv"], cdt)  # [B*Sm, 2D] cdt
    x = mha_proj(q.reshape(B, S, D), kv.reshape(B, Sm, 2 * D), src_pad_mask,
                 ca["wo"], ca["bo"], x, H, dk, scale, cdt, approx)    # [B, S, D] f32

    # sublayer[2]: x + w2(relu(w1(LN2(x))))  (fully fused, hidden stays in VMEM)
    out2d = ffn(x.reshape(B * S, D), params["ln2_a"], params["ln2_b"],
                params["w1"], params["b1"], params["w2"], params["b2"], cdt)
    return out2d.reshape(B, S, D)


# --------------------------- pure-JAX reference ---------------------------- #

def _ref_layernorm(x, a, b):
    mean = x.mean(-1, keepdims=True)
    std = jnp.sqrt(jnp.sum((x - mean) ** 2, -1, keepdims=True) / (x.shape[-1] - 1))
    return a * (x - mean) / (std + EPS) + b


def _ref_mha(xq, xk, xv, mask, p, H):
    B, Sq, D = xq.shape
    Sk = xk.shape[1]
    dk = D // H
    q = (xq @ p["wq"] + p["bq"]).reshape(B, Sq, H, dk).transpose(0, 2, 1, 3)
    k = (xk @ p["wk"] + p["bk"]).reshape(B, Sk, H, dk).transpose(0, 2, 1, 3)
    v = (xv @ p["wv"] + p["bv"]).reshape(B, Sk, H, dk).transpose(0, 2, 1, 3)
    s = jnp.einsum("bhqd,bhkd->bhqk", q, k) / math.sqrt(dk)
    s = jnp.where(mask[:, None, :, :] == 0.0, -1e9, s)
    pattn = jax.nn.softmax(s, axis=-1)
    o = jnp.einsum("bhqk,bhkd->bhqd", pattn, v).transpose(0, 2, 1, 3).reshape(B, Sq, D)
    return o @ p["wo"] + p["bo"]


def _ref_decoder(x, m, src_mask, tgt_mask, pr, H):
    xn = _ref_layernorm(x, pr["ln0_a"], pr["ln0_b"])
    x = x + _ref_mha(xn, xn, xn, tgt_mask, pr["self_attn"], H)
    xn = _ref_layernorm(x, pr["ln1_a"], pr["ln1_b"])
    x = x + _ref_mha(xn, m, m, src_mask, pr["src_attn"], H)
    xn = _ref_layernorm(x, pr["ln2_a"], pr["ln2_b"])
    return x + (jnp.maximum(xn @ pr["w1"] + pr["b1"], 0.0) @ pr["w2"] + pr["b2"])


# --------------------------------- main ------------------------------------ #

def _init_params(key, D, d_ff):
    ks = jax.random.split(key, 10)

    def attn_params(k):
        kk = jax.random.split(k, 4)
        return {
            "wq": 0.02 * jax.random.normal(kk[0], (D, D), jnp.float32), "bq": jnp.zeros((D,), jnp.float32),
            "wk": 0.02 * jax.random.normal(kk[1], (D, D), jnp.float32), "bk": jnp.zeros((D,), jnp.float32),
            "wv": 0.02 * jax.random.normal(kk[2], (D, D), jnp.float32), "bv": jnp.zeros((D,), jnp.float32),
            "wo": 0.02 * jax.random.normal(kk[3], (D, D), jnp.float32), "bo": jnp.zeros((D,), jnp.float32),
        }

    return {
        "self_attn": attn_params(ks[0]),
        "src_attn": attn_params(ks[1]),
        "w1": 0.02 * jax.random.normal(ks[2], (D, d_ff), jnp.float32), "b1": jnp.zeros((d_ff,), jnp.float32),
        "w2": 0.02 * jax.random.normal(ks[3], (d_ff, D), jnp.float32), "b2": jnp.zeros((D,), jnp.float32),
        "ln0_a": jnp.ones((D,), jnp.float32), "ln0_b": jnp.zeros((D,), jnp.float32),
        "ln1_a": jnp.ones((D,), jnp.float32), "ln1_b": jnp.zeros((D,), jnp.float32),
        "ln2_a": jnp.ones((D,), jnp.float32), "ln2_b": jnp.zeros((D,), jnp.float32),
    }


if __name__ == "__main__":
    B, S, Sm, D, H, d_ff = 2, 8, 8, 32, 4, 64

    key = jax.random.PRNGKey(0)
    kx, km, kp = jax.random.split(key, 3)
    x = jax.random.normal(kx, (B, S, D), jnp.float32)
    memory = jax.random.normal(km, (B, Sm, D), jnp.float32)
    raw_params = _init_params(kp, D, d_ff)

    # src padding mask [B, Sm]: last memory position of batch element 1 masked out.
    src_pad = jnp.ones((B, Sm), jnp.float32).at[1, Sm - 1].set(0.0)

    # Dense masks only for the pure-JAX reference (kernel gets causal in-kernel + [B,Sm]).
    tgt_mask = jnp.tril(jnp.ones((S, S), jnp.float32))[None].repeat(B, axis=0)
    src_mask = jnp.broadcast_to(src_pad[:, None, :], (B, S, Sm))
    ref = _ref_decoder(x, memory, src_mask, tgt_mask, raw_params, H)

    # f32 path: exact numerics check against the reference.
    p_f32 = prepare_params(raw_params, jnp.float32)
    out_f32 = jax.block_until_ready(
        decoder_layer(x, memory, src_pad, p_f32, H, compute_dtype=jnp.float32))
    assert out_f32.shape == (B, S, D)
    assert jnp.max(jnp.abs(out_f32 - ref)) < 1e-4, "f32 path mismatch vs reference"

    # bf16 MXU-operand path (production default): looser, bf16-appropriate tolerance.
    p_bf16 = prepare_params(raw_params, jnp.bfloat16)
    out_bf16 = jax.block_until_ready(
        decoder_layer(x, memory, src_pad, p_bf16, H, compute_dtype=jnp.bfloat16))
    assert out_bf16.shape == (B, S, D)
    assert jnp.max(jnp.abs(out_bf16 - ref)) < 2e-2, "bf16 path mismatch vs reference"

    print("KERNEL_OK")
</pallas_src>

<mosaic_0001>
module attributes {stable_mosaic.version = 11 : i64} {
  func.func @_ln_matmul_kernel(%arg0: i32, %arg1: i32, %arg2: memref<16x32xf32, #tpu.memory_space<vmem>>, %arg3: memref<1x32xf32, #tpu.memory_space<vmem>>, %arg4: memref<1x32xf32, #tpu.memory_space<vmem>>, %arg5: memref<32x96xf32, #tpu.memory_space<vmem>>, %arg6: memref<1x96xf32, #tpu.memory_space<vmem>>, %arg7: memref<16x96xf32, #tpu.memory_space<vmem>>, %arg8: memref<16x32xf32, #tpu.memory_space<vmem>>) attributes {dimension_semantics = [#tpu.dimension_semantics<parallel>, #tpu.dimension_semantics<arbitrary>], iteration_bounds = array<i64: 1, 1>, scalar_prefetch = 0 : i64, scratch_operands = 1 : i64, tpu.core_type = #tpu.core_type<tc>, window_params = [{transform_indices = @transform_0, window_bounds = array<i64: 16, 32>}, {pipeline_mode = #tpu.pipeline_mode<synchronous>, transform_indices = @transform_1, window_bounds = array<i64: 1, 32>}, {pipeline_mode = #tpu.pipeline_mode<synchronous>, transform_indices = @transform_2, window_bounds = array<i64: 1, 32>}, {transform_indices = @transform_3, window_bounds = array<i64: 32, 96>}, {transform_indices = @transform_4, window_bounds = array<i64: 1, 96>}, {transform_indices = @transform_5, window_bounds = array<i64: 16, 96>}]} {
    %c0_i32 = arith.constant 0 : i32
    %0 = arith.cmpi eq, %arg1, %c0_i32 : i32
    %1 = arith.extui %0 : i1 to i32
    %c0_i32_0 = arith.constant 0 : i32
    %2 = arith.cmpi ne, %1, %c0_i32_0 : i32
    scf.if %2 {
      %c0_8 = arith.constant 0 : index
      %c0_9 = arith.constant 0 : index
      %10 = vector.load %arg2[%c0_8, %c0_9] : memref<16x32xf32, #tpu.memory_space<vmem>>, vector<16x32xf32>
      %c0_10 = arith.constant 0 : index
      %c0_11 = arith.constant 0 : index
      %11 = vector.load %arg3[%c0_10, %c0_11] : memref<1x32xf32, #tpu.memory_space<vmem>>, vector<1x32xf32>
      %c0_12 = arith.constant 0 : index
      %c0_13 = arith.constant 0 : index
      %12 = vector.load %arg4[%c0_12, %c0_13] : memref<1x32xf32, #tpu.memory_space<vmem>>, vector<1x32xf32>
      %cst_14 = arith.constant dense<0.000000e+00> : vector<16xf32>
      %13 = vector.multi_reduction <add>, %10, %cst_14 [1] : vector<16x32xf32> to vector<16xf32>
      %14 = vector.shape_cast %13 : vector<16xf32> to vector<16x1xf32>
      %cst_15 = arith.constant 3.200000e+01 : f32
      %15 = vector.broadcast %cst_15 : f32 to vector<16x1xf32>
      %16 = arith.divf %14, %15 : vector<16x1xf32>
      %17 = vector.broadcast %16 : vector<16x1xf32> to vector<16x32xf32>
      %18 = arith.subf %10, %17 : vector<16x32xf32>
      %19 = arith.mulf %18, %18 : vector<16x32xf32>
      %cst_16 = arith.constant dense<0.000000e+00> : vector<16xf32>
      %20 = vector.multi_reduction <add>, %19, %cst_16 [1] : vector<16x32xf32> to vector<16xf32>
      %21 = vector.shape_cast %20 : vector<16xf32> to vector<16x1xf32>
      %cst_17 = arith.constant 3.100000e+01 : f32
      %22 = vector.broadcast %cst_17 : f32 to vector<16x1xf32>
      %23 = arith.divf %21, %22 : vector<16x1xf32>
      %24 = vector.broadcast %11 : vector<1x32xf32> to vector<16x32xf32>
      %25 = arith.mulf %24, %18 : vector<16x32xf32>
      %26 = math.sqrt %23 : vector<16x1xf32>
      %cst_18 = arith.constant 9.99999997E-7 : f32
      %27 = vector.broadcast %cst_18 : f32 to vector<16x1xf32>
      %28 = arith.addf %26, %27 : vector<16x1xf32>
      %29 = vector.broadcast %28 : vector<16x1xf32> to vector<16x32xf32>
      %30 = arith.divf %25, %29 : vector<16x32xf32>
      %31 = vector.broadcast %12 : vector<1x32xf32> to vector<16x32xf32>
      %32 = arith.addf %30, %31 : vector<16x32xf32>
      %c0_19 = arith.constant 0 : index
      %c0_20 = arith.constant 0 : index
      %33 = vector.load %arg8[%c0_19, %c0_20] : memref<16x32xf32, #tpu.memory_space<vmem>>, vector<16x32xf32>
      tpu.vector_store %arg8[%c0_19, %c0_20], %32 {strides = array<i32>} : memref<16x32xf32, #tpu.memory_space<vmem>>, vector<16x32xf32>,
    } else {
    }
    %c0 = arith.constant 0 : index
    %c0_1 = arith.constant 0 : index
    %3 = vector.load %arg8[%c0, %c0_1] : memref<16x32xf32, #tpu.memory_space<vmem>>, vector<16x32xf32>
    %c0_2 = arith.constant 0 : index
    %c0_3 = arith.constant 0 : index
    %4 = vector.load %arg5[%c0_2, %c0_3] : memref<32x96xf32, #tpu.memory_space<vmem>>, vector<32x96xf32>
    %cst = arith.constant dense<0.000000e+00> : vector<16x96xf32>
    %5 = tpu.matmul %3, %4, %cst {dimension_numbers = #tpu.dot_dimension_numbers<[1], [0], [0], [1], [0, 0, 1, 1], [], []>} : vector<16x32xf32>, vector<32x96xf32>, vector<16x96xf32> -> vector<16x96xf32>
    %c0_4 = arith.constant 0 : index
    %c0_5 = arith.constant 0 : index
    %6 = vector.load %arg6[%c0_4, %c0_5] : memref<1x96xf32, #tpu.memory_space<vmem>>, vector<1x96xf32>
    %7 = vector.broadcast %6 : vector<1x96xf32> to vector<16x96xf32>
    %8 = arith.addf %5, %7 : vector<16x96xf32>
    %c0_6 = arith.constant 0 : index
    %c0_7 = arith.constant 0 : index
    %9 = vector.load %arg7[%c0_6, %c0_7] : memref<16x96xf32, #tpu.memory_space<vmem>>, vector<16x96xf32>
    tpu.vector_store %arg7[%c0_6, %c0_7], %8 {strides = array<i32>} : memref<16x96xf32, #tpu.memory_space<vmem>>, vector<16x96xf32>,
    return
  }
  func.func @transform_0(%arg0: i32, %arg1: i32) -> (i32, i32) {
    %c0_i32 = arith.constant 0 : i32
    %c0_i32_0 = arith.constant 0 : i32
    return %arg0, %c0_i32 : i32, i32
  }
  func.func @transform_1(%arg0: i32, %arg1: i32) -> (i32, i32) {
    %c0_i32 = arith.constant 0 : i32
    %c0_i32_0 = arith.constant 0 : i32
    %c0_i32_1 = arith.constant 0 : i32
    return %c0_i32, %c0_i32_0 : i32, i32
  }
  func.func @transform_2(%arg0: i32, %arg1: i32) -> (i32, i32) {
    %c0_i32 = arith.constant 0 : i32
    %c0_i32_0 = arith.constant 0 : i32
    %c0_i32_1 = arith.constant 0 : i32
    return %c0_i32, %c0_i32_0 : i32, i32
  }
  func.func @transform_3(%arg0: i32, %arg1: i32) -> (i32, i32) {
    %c0_i32 = arith.constant 0 : i32
    %c0_i32_0 = arith.constant 0 : i32
    return %c0_i32, %arg1 : i32, i32
  }
  func.func @transform_4(%arg0: i32, %arg1: i32) -> (i32, i32) {
    %c0_i32 = arith.constant 0 : i32
    %c0_i32_0 = arith.constant 0 : i32
    return %c0_i32, %arg1 : i32, i32
  }
  func.func @transform_5(%arg0: i32, %arg1: i32) -> (i32, i32) {
    %c0_i32 = arith.constant 0 : i32
    return %arg0, %arg1 : i32, i32
  }
}

</mosaic_0001>

<bundles_post_ra>
// kernel: tpu_custom_call.1
= control target key start
LH: loop header
LB: loop body
LE: loop exit
PB: predicated region body
PF: predicated region fallthrough
CT: control target
= control target key end

     0   :  { %10 = vsyncpa [#allocation4], 0  ;;  %s446_s0 = inlined_call_operand.hbm [shape: f32[16,32], index: 0, kind: input, shape index: {}]   ;;  %s447_s1 = inlined_call_operand.vmem [shape: f32[1,32], index: 1, kind: input, shape index: {}]   ;;  %s448_s2 = inlined_call_operand.vmem [shape: f32[1,32], index: 2, kind: input, shape index: {}]   ;;  %s449_s3 = inlined_call_operand.hbm [shape: f32[32,96], index: 3, kind: input, shape index: {}]   ;;  %s450_s4 = inlined_call_operand.vmem [shape: f32[1,96], index: 4, kind: input, shape index: {}]   ;;  %s451_s5 = inlined_call_operand.hbm [shape: f32[16,96], index: 5, kind: output, shape index: {}]  }
   0x1   :  { %11 = vsyncpa [#allocation7], 0 }
   0x2   :  { %12 = vsyncpa [#allocation5], 0  ;;  %s349_s18 = smov [#allocation3]   ;;  %s277_s22 = scalar_lea.hbm %s446_s0, 256 }
   0x3   :  { %s18_s19 = sshll.u32 %s349_s18, 4  ;;  %p278_p0 = scmp.ne.s32.totalorder %s446_s0, %s277_s22  ;;  %s19_s19 = int_to_ptr.vmem [resolvable:$true] %s18_s19 }
   0x4   :  { %p281_p1 = scmp.lt.u32.totalorder %s277_s22, %s446_s0 }
   0x6   :  { %p283_p2 = pnand %p281_p1, %p278_p0 }
   0x8   :  { %286 = shalt.err (!%p283_p2)
}
   0x9   :  { %s287_s27 = scalar_lea.vmem %s19_s19, 256  ;;  %p292_p4 = scmp.lt.s32.totalorder %s19_s19, %s19_s19 }
   0xa   :  { %p288_p3 = scmp.ne.s32.totalorder %s19_s19, %s287_s27  ;;  %p293_p5 = scmp.lt.s32.totalorder %s287_s27, %s287_s27 }
   0xc   :  { %p294_p6 = por %p293_p5, %p292_p4 }
   0xe   :  { %p295_p7 = pnand %p294_p6, %p288_p3 }
  0x10   :  { %298 = shalt.err (!%p295_p7)
}
  0x11   :  { %s350_s28 = smov 128   ;;  %s351_s29 = smov 8  }
  0x12   :  { %24 = dma.hbm_to_vmem [thread:$0]  %s446_s0, 256, %s19_s19, [#allocation4], %s350_s28, %s350_s28, %s351_s29  }
  0x13   :  { %s352_s7 = smov [#allocation6]   ;;  %s299_s11 = scalar_lea.hbm %s449_s3, 512 }
  0x14   :  { %s34_s8 = sshll.u32 %s352_s7, 4  ;;  %p300_p8 = scmp.ne.s32.totalorder %s449_s3, %s299_s11  ;;  %s35_s8 = int_to_ptr.vmem [resolvable:$true] %s34_s8 }
  0x15   :  { %p303_p9 = scmp.lt.u32.totalorder %s299_s11, %s449_s3 }
  0x17   :  { %p305_p10 = pnand %p303_p9, %p300_p8 }
  0x19   :  { %308 = shalt.err (!%p305_p10)
}
  0x1a   :  { %s309_s16 = scalar_lea.vmem %s35_s8, 512  ;;  %p314_p12 = scmp.lt.s32.totalorder %s35_s8, %s35_s8 }
  0x1b   :  { %p310_p11 = scmp.ne.s32.totalorder %s35_s8, %s309_s16  ;;  %p315_p13 = scmp.lt.s32.totalorder %s309_s16, %s309_s16 }
  0x1d   :  { %p316_p0 = por %p315_p13, %p314_p12 }
  0x1f   :  { %p317_p1 = pnand %p316_p0, %p310_p11 }
  0x21   :  { %320 = shalt.err (!%p317_p1)
}
  0x22   :  { %40 = dma.hbm_to_vmem [thread:$0]  %s449_s3, 512, %s35_s8, [#allocation7], %s350_s28, %s350_s28, %s351_s29  }
  0x23   :  { %343 = dma.done.wait [#allocation4], 256  }
  0x24   :  { %344 = vsyncadd [#allocation4], 4294967040 }
  0x25   :  { %345 = dma.done.wait [#allocation7], 512  }
  0x26   :  { %346 = vsyncadd [#allocation7], 4294966784  ;;  %vm57_vm0 = vcmask 261120   ;;  %v53_v0 = vld [vmem:[#allocation3] sm:$0xff]  ;;  %v54_v1 = vld [vmem:[#allocation3 + $0x8] sm:$0xff]  ;;  %vm213_vm5 = vcmask 785408  }
  0x27   :  { %v58_v2 = vsel %vm57_vm0, %v53_v0, 0.0  ;;  %v61_v3 = vsel %vm57_vm0, %v54_v1, 0.0  ;;  %v120_v14 = vld [vmem:[#allocation6] sm:$0xff]  ;;  %v121_v15 = vld [vmem:[#allocation6 + $0x8] sm:$0xff]  ;;  %v122_v17 = vld [vmem:[#allocation6 + $0x10] sm:$0xff] }
  0x28   :  { %59 = vadd.xlane.f32.xlu0 %v58_v2  ;;  %v256_v16 = vpack.c.bf16 %v121_v15, %v120_v14  ;;  %v123_v18 = vld [vmem:[#allocation6 + $0x18] sm:$0xff]  ;;  %v234_v36 = vld [vmem:[%s447_s1] ss:$0 sm:$0xff] }
  0x29   :  { %v260_v19 = vpack.c.bf16 %v123_v18, %v122_v17  ;;  %v235_v39 = vld [vmem:[%s448_s2] ss:$0 sm:$0xff]  ;;  %s353_s2 = smov [#allocation8]  }
  0x2a   :  { %257 = vmatprep.subr.bf16.mxu0 %v256_v16  ;;  %v236_v48 = vld [vmem:[%s450_s4] ss:$0 sm:$0xff]  ;;  %s221_s22 = sshll.u32 %s353_s2, 4  ;;  %s222_s22 = int_to_ptr.vmem [resolvable:$true] %s221_s22 }
  0x2b   :  { %259 = vmatpush3.bf16.msra.mxu0 %v256_v16  ;;  %s321_s23 = scalar_lea.vmem %s222_s22, 256  ;;  %p326_p3 = scmp.lt.s32.totalorder %s222_s22, %s222_s22 }
  0x2c   :  { %62 = vadd.xlane.f32.xlu0 %v61_v3  ;;  %261 = vmatprep.subr.bf16.mxu0 %v260_v19  ;;  %p322_p2 = scmp.ne.s32.totalorder %s222_s22, %s321_s23  ;;  %p327_p4 = scmp.lt.s32.totalorder %s321_s23, %s321_s23 }
  0x2e   :  { %p328_p5 = por %p327_p4, %p326_p3 }
  0x2f   :  { %263 = vmatpush3.bf16.msra.mxu0 %v260_v19 }
  0x30   :  { %p329_p6 = pnand %p328_p5, %p322_p2 }
  0xb5   :  { %v60_v4 = vpop.xlane.xlu0 %59 }
  0xb6   :  { %v65_v5 = vmul.f32 0.03125, %v60_v4 }
  0xb8   :  { %v67_v6 = vsub.f32 %v53_v0, %v65_v5 }
  0xb9   :  { %v63_v7 = vpop.xlane.xlu0 %62 }
  0xba   :  { %v66_v8 = vmul.f32 0.03125, %v63_v7  ;;  %v69_v9 = vmul.f32 %v67_v6, %v67_v6  ;;  %v86_v37 = vmul.f32 %v234_v36, %v67_v6 }
  0xbc   :  { %v68_v10 = vsub.f32 %v54_v1, %v66_v8  ;;  %v71_v11 = vsel %vm57_vm0, %v69_v9, 0.0 }
  0xbd   :  { %72 = vadd.xlane.f32.xlu1 %v71_v11 }
  0xbe   :  { %v70_v12 = vmul.f32 %v68_v10, %v68_v10  ;;  %v87_v41 = vmul.f32 %v234_v36, %v68_v10 }
  0xc0   :  { %v74_v13 = vsel %vm57_vm0, %v70_v12, 0.0 }
  0xc1   :  { %75 = vadd.xlane.f32.xlu1 %v74_v13 }
 0x14a   :  { %v73_v20 = vpop.xlane.xlu1 %72 }
 0x14b   :  { %v78_v21 = vmul.f32 0.032258064, %v73_v20 }
 0x14d   :  { %269 = vrsqrt.f32 %v78_v21  ;;  %vm90_vm1 = vcmp.eq.f32.partialorder %v78_v21, inf  ;;  %v93_v26 = vand.u32 2147483648, %v78_v21  ;;  %vm92_vm2 = vcmp.eq.f32.partialorder %v78_v21, 0.0 }
 0x14e   :  { %v76_v22 = vpop.xlane.xlu1 %75 }
 0x14f   :  { %v79_v23 = vmul.f32 0.032258064, %v76_v22 }
 0x151   :  { %271 = vrsqrt.f32 %v79_v23  ;;  %vm97_vm3 = vcmp.eq.f32.partialorder %v79_v23, inf  ;;  %v100_v32 = vand.u32 2147483648, %v79_v23  ;;  %vm99_vm4 = vcmp.eq.f32.partialorder %v79_v23, 0.0 }
 0x157   :  { %v270_v24 = vpop.eup %269 }
 0x158   :  { %v89_v25 = vmul.f32 %v270_v24, %v78_v21 }
 0x15a   :  { %v91_v27 = vsel %vm90_vm1, %v78_v21, %v89_v25 }
 0x15b   :  { %v272_v28 = vpop.eup %271  ;;  %v94_v29 = vsel %vm92_vm2, %v93_v26, %v91_v27 }
 0x15c   :  { %v102_v30 = vadd.f32 1e-06, %v94_v29  ;;  %v96_v31 = vmul.f32 %v272_v28, %v79_v23 }
 0x15e   :  { %273 = vrcp.f32 %v102_v30  ;;  %v98_v33 = vsel %vm97_vm3, %v79_v23, %v96_v31 }
 0x15f   :  { %v101_v34 = vsel %vm99_vm4, %v100_v32, %v98_v33 }
 0x160   :  { %v103_v35 = vadd.f32 1e-06, %v101_v34 }
 0x162   :  { %275 = vrcp.f32 %v103_v35 }
 0x168   :  { %v274_v38 = vpop.eup %273 }
 0x169   :  { %v105_v40 = vmul.f32 %v274_v38, %v86_v37 }
 0x16b   :  { %v114_v42 = vadd.f32 %v235_v39, %v105_v40 }
 0x16c   :  { %v276_v43 = vpop.eup %275 }
 0x16d   :  { %116 = vst.msk [vmem:[#allocation2] sm:$0xff] %vm57_vm0, %v114_v42  ;;  %v107_v44 = vmul.f32 %v276_v43, %v87_v41 }
 0x16f   :  { %v115_v45 = vadd.f32 %v235_v39, %v107_v44 }
 0x171   :  { %117 = vst.msk [vmem:[#allocation2 + $0x8] sm:$0xff] %vm57_vm0, %v115_v45 }
 0x174   :  { %v118_v46 = vld [vmem:[#allocation2] sm:$0xff] }
 0x175   :  { %253 = vmatprep.mubr.msk.f32.mxu0 %vm57_vm0, %v118_v46 }
 0x178   :  { %v119_v47 = vld [vmem:[#allocation2 + $0x8] sm:$0xff] }
 0x179   :  { %254 = vmatmul.mubr.msk.f32.vlgmr.msra.gmra.mrb[0].mxu0 %vm57_vm0, %v119_v47 }
 0x24c   :  { %v255_v49 = vpop.f32.mrb[0].mxu0 }
 0x24d   :  { %v210_v50 = vadd.f32 %v255_v49, %v236_v48  ;;  %v204_v51 = vpop.f32.mrb[1].mxu0 }
 0x24e   :  { %v205_v52 = vadd.f32 %v236_v48, %v204_v51 }
 0x24f   :  { %215 = vst.msk [vmem:[#allocation8 + $0x8] sm:$0xff] %vm213_vm5, %v210_v50 }
 0x250   :  { %214 = vst.msk [vmem:[#allocation8] sm:$0xff] %vm213_vm5, %v205_v52 }
 0x251   :  { %332 = shalt.err (!%p329_p6)
}
 0x252   :  { %s333_s4 = scalar_lea.hbm %s451_s5, 256 }
 0x253   :  { %p334_p7 = scmp.ne.s32.totalorder %s451_s5, %s333_s4  ;;  %p337_p8 = scmp.lt.u32.totalorder %s333_s4, %s451_s5 }
 0x255   :  { %p339_p9 = pnand %p337_p8, %p334_p7 }
 0x257   :  { %342 = shalt.err (!%p339_p9)
}
 0x258   :  { %227 = dma.vmem_to_hbm [thread:$0]  %s222_s22, 256, %s451_s5, [#allocation5], %s350_s28, %s350_s28, %s351_s29  }
 0x259   :  { %347 = dma.done.wait [#allocation5], 256  }
 0x25a   :  { %348 = vsyncadd [#allocation5], 4294967040 }
 0x25b   :  { %231 = vsyncpa [#allocation4], 1 }
 0x25c   :  { %232 = vsyncpa [#allocation7], 1 }
 0x25d   :  { %233 = vsyncpa [#allocation5], 1 }

</bundles_post_ra>
